<compile_context>
chip_gen: v7x
topology: tpu7x:2x2x1
jax: 0.10.0
libtpu: 0.0.40
codegen_flags: <defaults>
</compile_context>

<pallas_src>
import math

import jax
import jax.numpy as jnp
from jax.experimental import pallas as pl
from jax.experimental.pallas import tpu as pltpu


def make_positional_encoding(d_model: int, max_len: int) -> jnp.ndarray:
    """Deterministic construction of the PE buffer, matching the PyTorch __init__."""
    position = jnp.arange(0, max_len, dtype=jnp.float32)[:, None]              # [max_len, 1]
    div_term = jnp.exp(
        jnp.arange(0, d_model, 2, dtype=jnp.float32) * (-math.log(10000.0) / d_model)
    )                                                                           # [d_model//2]
    pe = jnp.zeros((max_len, d_model), dtype=jnp.float32)
    pe = pe.at[:, 0::2].set(jnp.sin(position * div_term))
    pe = pe.at[:, 1::2].set(jnp.cos(position * div_term))
    return pe[None, :, :]                                                       # [1, max_len, d_model]


def _pe_add_kernel(x_ref, pe_ref, o_ref):
    # x_ref / pe_ref / o_ref: (1, tS, D) tiles. Elementwise add on the VPU;
    # explicit cast so narrow output dtypes (bf16) are handled on the store.
    o_ref[...] = (x_ref[...] + pe_ref[...]).astype(o_ref.dtype)


def _choose_row_tile(S: int, D: int, itemsize: int, min_rows: int,
                     target_bytes: int = 2 << 20) -> int:
    """Pick a row-tile tS that divides S, is a multiple of the sublane packing
    (8 for f32, 16 for bf16), and keeps one block at ~target_bytes."""
    if S <= min_rows or S % min_rows != 0:
        # Can't tile legally; fall back to the full dim (always legal).
        return S
    max_rows = max(min_rows, target_bytes // max(1, D * itemsize))
    max_rows = (max_rows // min_rows) * min_rows
    ts = min(S, max_rows)
    while S % ts != 0:
        ts -= min_rows
    return ts


def positional_encoding_forward(x: jnp.ndarray, pe: jnp.ndarray) -> jnp.ndarray:
    """x: [B, S, D], pe: [1, max_len, D] (f32 buffer). Returns x + pe[:, :S]."""
    B, S, D = x.shape
    # Glue: static slice of the registered buffer, stored in x.dtype so the
    # HBM read of pe is as cheap as possible (and the add stays in x.dtype).
    pe_slice = pe[:, :S, :].astype(x.dtype)

    itemsize = jnp.dtype(x.dtype).itemsize
    min_rows = 8 if itemsize >= 4 else (32 // itemsize)   # 8 for f32, 16 for bf16
    tS = _choose_row_tile(S, D, itemsize, min_rows)
    nS = S // tS

    # TODO(synk): if D were < 128 and S*D % 128 == 0, a lane-dense [B, S*D/128, 128]
    # view of x/pe would avoid masked partial stores; d_model=512 makes this moot.

    return pl.pallas_call(
        _pe_add_kernel,
        out_shape=jax.ShapeDtypeStruct((B, S, D), x.dtype),
        grid_spec=pltpu.PrefetchScalarGridSpec(
            num_scalar_prefetch=0,
            grid=(B, nS),
            in_specs=[
                # per-batch, per-row-tile block of x
                pl.BlockSpec((1, tS, D), lambda b, s: (b, s, 0)),
                # pe broadcast across batch: same row-tile for every b
                pl.BlockSpec((1, tS, D), lambda b, s: (0, s, 0)),
            ],
            out_specs=pl.BlockSpec((1, tS, D), lambda b, s: (b, s, 0)),
        ),
        compiler_params=pltpu.CompilerParams(
            dimension_semantics=("parallel", "parallel"),
        ),
    )(x, pe_slice)


if __name__ == "__main__":
    # Small shapes consistent with the module's forward: [batch, seq, d_model],
    # d_model = 512 and max_len = 100 as in the PyTorch spec.
    B, S, D = 2, 8, 512
    MAX_LEN = 100

    key = jax.random.PRNGKey(0)
    x = jax.random.normal(key, (B, S, D), dtype=jnp.float32)

    pe = make_positional_encoding(D, MAX_LEN)

    out = positional_encoding_forward(x, pe)
    out = jax.block_until_ready(out)

    # Reference check (pure JAX), same semantics as the PyTorch forward.
    ref = x + pe[:, :S, :].astype(x.dtype)
    assert out.shape == (B, S, D)
    assert out.dtype == x.dtype
    assert jnp.allclose(out, ref, atol=1e-6, rtol=1e-6)

    print("KERNEL_OK")
</pallas_src>

<mosaic_0001>
module attributes {stable_mosaic.version = 11 : i64} {
  func.func @_pe_add_kernel(%arg0: i32, %arg1: i32, %arg2: memref<1x8x512xf32, #tpu.memory_space<vmem>>, %arg3: memref<1x8x512xf32, #tpu.memory_space<vmem>>, %arg4: memref<1x8x512xf32, #tpu.memory_space<vmem>>) attributes {dimension_semantics = [#tpu.dimension_semantics<parallel>, #tpu.dimension_semantics<parallel>], iteration_bounds = array<i64: 2, 1>, scalar_prefetch = 0 : i64, scratch_operands = 0 : i64, tpu.core_type = #tpu.core_type<tc>, window_params = [{transform_indices = @transform_0, window_bounds = array<i64: 1, 8, 512>}, {transform_indices = @transform_1, window_bounds = array<i64: 1, 8, 512>}, {transform_indices = @transform_2, window_bounds = array<i64: 1, 8, 512>}]} {
    %c0 = arith.constant 0 : index
    %c0_0 = arith.constant 0 : index
    %c0_1 = arith.constant 0 : index
    %0 = vector.load %arg2[%c0, %c0_0, %c0_1] : memref<1x8x512xf32, #tpu.memory_space<vmem>>, vector<1x8x512xf32>
    %c0_2 = arith.constant 0 : index
    %c0_3 = arith.constant 0 : index
    %c0_4 = arith.constant 0 : index
    %1 = vector.load %arg3[%c0_2, %c0_3, %c0_4] : memref<1x8x512xf32, #tpu.memory_space<vmem>>, vector<1x8x512xf32>
    %2 = arith.addf %0, %1 : vector<1x8x512xf32>
    %c0_5 = arith.constant 0 : index
    %c0_6 = arith.constant 0 : index
    %c0_7 = arith.constant 0 : index
    %3 = vector.load %arg4[%c0_5, %c0_6, %c0_7] : memref<1x8x512xf32, #tpu.memory_space<vmem>>, vector<1x8x512xf32>
    tpu.vector_store %arg4[%c0_5, %c0_6, %c0_7], %2 {strides = array<i32>} : memref<1x8x512xf32, #tpu.memory_space<vmem>>, vector<1x8x512xf32>,
    return
  }
  func.func @transform_0(%arg0: i32, %arg1: i32) -> (i32, i32, i32) {
    %c0_i32 = arith.constant 0 : i32
    %c0_i32_0 = arith.constant 0 : i32
    return %arg0, %arg1, %c0_i32 : i32, i32, i32
  }
  func.func @transform_1(%arg0: i32, %arg1: i32) -> (i32, i32, i32) {
    %c0_i32 = arith.constant 0 : i32
    %c0_i32_0 = arith.constant 0 : i32
    %c0_i32_1 = arith.constant 0 : i32
    return %c0_i32, %arg1, %c0_i32_0 : i32, i32, i32
  }
  func.func @transform_2(%arg0: i32, %arg1: i32) -> (i32, i32, i32) {
    %c0_i32 = arith.constant 0 : i32
    %c0_i32_0 = arith.constant 0 : i32
    return %arg0, %arg1, %c0_i32 : i32, i32, i32
  }
}

</mosaic_0001>

<bundles_post_ra>
// kernel: tpu_custom_call.1
= control target key start
LH: loop header
LB: loop body
LE: loop exit
PB: predicated region body
PF: predicated region fallthrough
CT: control target
= control target key end

     0   :  { %7 = vsyncpa [#allocation3], 0  ;;  %s800_s0 = inlined_call_operand.hbm [shape: f32[2,8,512], index: 0, kind: input, shape index: {}]   ;;  %s801_s1 = inlined_call_operand.hbm [shape: f32[1,8,512], index: 1, kind: input, shape index: {}]   ;;  %s802_s2 = inlined_call_operand.hbm [shape: f32[2,8,512], index: 2, kind: output, shape index: {}]  }
   0x1   :  { %9 = vsyncpa [#allocation3 + $0x1], 0 }
   0x2   :  { %10 = vsyncpa [#allocation6], 0 }
   0x3   :  { %11 = vsyncpa [#allocation4], 0 }
   0x4   :  { %13 = vsyncpa [#allocation4 + $0x1], 0  ;;  %s584_s9 = smov 0   ;;  %s586_s10 = smov 0  }
   0x5   :  { %s588_s11 = smov 0   ;;  %s590_s12 = smov 0  }
   0x6   :  { %s592_s13 = smov 0   ;;  %s594_s14 = smov 0  }
   0x7 LB: > { %s328_s15 = sadd.s32 4294967295, %s564_s14   ;;  %s329_s16 = sadd.s32 4294967294, %s564_s14   ;;  %s564_s14 = sphi %s594_s14, %s19_s14   ;;  %s560_s13 = sphi %s592_s13, %s827_s13   ;;  %s556_s12 = sphi %s590_s12, %s826_s12   ;;  %s552_s11 = sphi %s588_s11, %s825_s11   ;;  %s548_s10 = sphi %s586_s10, %s824_s10   ;;  %s544_s9 = sphi %s584_s9, %s823_s9  }
   0x8   : > { %p53_p0 = scmp.ne.s32.totalorder %s548_s10, %s544_s9  ;;  %p618_p1 = scmp.eq.s32.totalorder %s328_s15, 0 }
   0x9   : > { %p622_p2 = scmp.eq.s32.totalorder %s328_s15, 1  ;;  %p111_p3 = scmp.eq.s32.totalorder %s329_s16, 1 }
   0xa   : > { %s807_s17 = scalar_select %p618_p1, 1, 0 }
   0xb   : > { %s808_s18 = scalar_select %p622_p2, 1, 0 }
   0xc   : > { %p628_p4 = por %p618_p1, %p53_p0  ;;  %p330_p5 = scmp.ge.s32.totalorder %s564_s14, 1 }
   0xd   : > { %p633_p6 = por %p111_p3, %p53_p0  ;;  %p118_p7 = scmp.lt.s32.totalorder %s564_s14, 3 }
   0xe   : > { %s809_s19 = scalar_select %p628_p4, 1, 0 }
   0xf   : > { %s810_s20 = scalar_select %p633_p6, 1, 0 }
  0x10   : > { %p638_p8 = pnand %p330_p5, %p118_p7  ;;  %s566_s22 = smov [#allocation5]  }
  0x11   : > { %s134_s23 = sshll.u32 %s566_s22, 4  ;;  %s31_s25 = sadd.s32 1, %s560_s13  ;;  %s135_s23 = int_to_ptr.vmem [resolvable:$true] %s134_s23 }
  0x12   : > { %s811_s21 = scalar_select %p638_p8, 1, 0 }
  0x13   : > { %p355_p10 = pneg %p638_p8  ;;  %s40_s26 = sadd.s32 1, %s552_s11 }
  0x14   : > { %p653_p12 = scmp.ge.s32.totalorder %s31_s25, 2  ;;  %s420_s30 = scalar_lea.hbm %s801_s1, 512 }
  0x15   : > { %p647_p11 = pnand %p355_p10, %p618_p1  ;;  %p421_p13 = scmp.ne.s32.totalorder %s801_s1, %s420_s30 }
  0x16   : > { %s813_s27 = scalar_select %p653_p12, 1, 0 }
  0x17   : > { %p422_p0 = pneg %p647_p11  ;;  %p427_p7 = scmp.lt.u32.totalorder %s420_s30, %s801_s1 }
  0x19   : > { %p423_p3 = pnand %p422_p0, %p421_p13 }
  0x1b   : > { %p424_p5 = pneg %p423_p3 }
  0x1d   : > { %p429_p10 = pnand %p427_p7, %p424_p5 }
  0x1f   : > { %432 = shalt.err (!%p429_p10)
}
  0x20   : > { %s433_s7 = scalar_lea.vmem %s135_s23, 512  ;;  %p441_p4 = scmp.lt.s32.totalorder %s135_s23, %s135_s23 }
  0x21   : > { %p434_p9 = scmp.ne.s32.totalorder %s135_s23, %s433_s7  ;;  %p442_p8 = scmp.lt.s32.totalorder %s433_s7, %s433_s7 }
  0x23   : > { %p436_p6 = pnand %p434_p9, %p422_p0  ;;  %p443_p2 = por %p442_p8, %p441_p4 }
  0x25   : > { %p437_p1 = pneg %p436_p6 }
  0x27   : > { %p444_p12 = pnand %p443_p2, %p437_p1 }
  0x29   : > { %447 = shalt.err (!%p444_p12)
}
  0x2a   : > { %358 = dma.hbm_to_vmem [thread:$0]  (!%p647_p11), %s801_s1, 512, %s135_s23, [#allocation6]  }
  0x2b   : > { %p814_p4 = scmp.ne.s32.totalorder %s813_s27, 0  ;;  %p47_p1 = scmp.ne.s32.totalorder %s552_s11, %s548_s10 }
  0x2c   : > { %p48_p2 = scmp.eq.s32.totalorder %s564_s14, 0  ;;  %p368_p6 = scmp.lt.s32.totalorder %s564_s14, 2 }
  0x2d   : > { %s829_s25 = smov (%p814_p4, %s31_s25), 0  ;;  %p815_p12 = scmp.ne.s32.totalorder %s808_s18, 0 }
  0x2e   : > { %s35_s16 = ssub.s32 %s560_s13, %s829_s25  ;;  %p49_p9 = por %p48_p2, %p47_p1 }
  0x2f   : > { %p38_p8 = scmp.eq.s32.totalorder %s35_s16, 0  ;;  %p685_p13 = por %p815_p12, %p47_p1 }
  0x30   : > { %s145_s24 = sand.u32 1, %s552_s11   ;;  %s345_s27 = sshll.u32 %s560_s13, 9 }
  0x31   : > { %s693_s28 = scalar_select %p38_p8, %s552_s11, %s40_s26  }
  0x32   : > { %s333_s23 = sshll.u32 %s145_s24, 5  ;;  %s699_s3 = scalar_lea.hbm %s800_s0, %s345_s27 }
  0x33   : > { %s149_s18 = scalar_lea.vmem [#allocation2], %s333_s23  ;;  %p703_p11 = pnand %p368_p6, %p49_p9 }
  0x34   : > { %s159_s4 = sshll.u32 %s149_s18, 4  ;;  %s146_s26 = scalar_lea.sflag [#allocation3], %s145_s24  ;;  %s701_s4 = int_to_ptr.vmem [resolvable:$true] %s159_s4 }
  0x35   : > { %s448_s6 = scalar_lea.hbm %s699_s3, 512  ;;  %p450_p3 = pneg %p703_p11 }
  0x36   : > { %p449_p0 = scmp.ne.s32.totalorder %s699_s3, %s448_s6  ;;  %s453_s15 = scalar_lea.hbm %s800_s0, 1024 }
  0x37   : > { %p454_p10 = scmp.lt.u32.totalorder %s699_s3, %s800_s0  ;;  %p455_p4 = scmp.lt.u32.totalorder %s453_s15, %s448_s6 }
  0x38   : > { %p451_p5 = pnand %p450_p3, %p449_p0  ;;  %p457_p2 = scmp.lt.u32.totalorder %s448_s6, %s699_s3 }
  0x39   : > { %p456_p1 = por %p455_p4, %p454_p10 }
  0x3a   : > { %p452_p7 = pneg %p451_p5 }
  0x3b   : > { %p458_p6 = por %p457_p2, %p456_p1 }
  0x3d   : > { %p459_p8 = pnand %p458_p6, %p452_p7 }
  0x3f   : > { %462 = shalt.err (!%p459_p8)
}
  0x40   : > { %s463_s24 = scalar_lea.vmem %s701_s4, 512  ;;  %s567_s27 = smov [#allocation2]  }
  0x41   : > { %p464_p9 = scmp.ne.s32.totalorder %s701_s4, %s463_s24  ;;  %s468_s29 = sshll.u32 %s567_s27, 4  ;;  %s469_s29 = int_to_ptr.vmem [resolvable:$false] %s468_s29 }
  0x42   : > { %s470_s30 = scalar_lea.vmem %s469_s29, 1024  ;;  %p471_p5 = scmp.lt.s32.totalorder %s701_s4, %s469_s29 }
  0x43   : > { %p466_p12 = pnand %p464_p9, %p450_p3  ;;  %p472_p10 = scmp.lt.s32.totalorder %s470_s30, %s463_s24 }
  0x45   : > { %p467_p0 = pneg %p466_p12  ;;  %p473_p4 = por %p472_p10, %p471_p5 }
  0x47   : > { %p474_p1 = pnand %p473_p4, %p467_p0 }
  0x49   : > { %477 = shalt.err (!%p474_p1)
}
  0x4a   : > { %362 = dma.hbm_to_vmem [thread:$0]  (!%p703_p11), %s699_s3, 512, %s701_s4, %s146_s26  }
  0x4b   : > { %p818_p7 = scmp.ne.s32.totalorder %s811_s21, 0 }
  0x4c   : > { %s735_s18 = sand.u32 (!%p818_p7), 1, %s548_s10   ;;  %p819_p3 = scmp.ne.s32.totalorder (!%p818_p7), %s809_s19, 0 }
  0x4d   : > { %168 = sbr.rel (%p818_p7) target bundleno = 113 (0x71), region = 28  ;;  %s337_s6 = sshll.u32 (!%p818_p7), %s735_s18, 5 }
  0x4e   : > { %s171_s7 = scalar_lea.sflag (!%p818_p7), [#allocation3], %s735_s18  ;;  %s174_s8 = scalar_lea.vmem (!%p818_p7), [#allocation2], %s337_s6 }
  0x54   : > { %531 = dma.done.wait (%p819_p3), %s171_s7, 512  }
  0x55   : > { %533 = vsyncadd (%p819_p3), %s171_s7, 4294966784  ;;  %p820_p2 = scmp.ne.s32.totalorder %s807_s17, 0 }
  0x57   : > { %535 = dma.done.wait (%p820_p2), [#allocation6], 512  }
  0x58   : > { %537 = vsyncadd (%p820_p2), [#allocation6], 4294966784  ;;  %v199_v0 = vld [vmem:[%s174_s8] sm:$0xff]  ;;  %s198_s21 = scalar_lea.vmem [#allocation7], %s337_s6  ;;  %v200_v2 = vld [vmem:[%s174_s8 + $0x8] sm:$0xff]  ;;  %s346_s4 = sshll.u32 %s556_s12, 9 }
  0x59   : > { %v203_v1 = vld [vmem:[#allocation5] sm:$0xff]  ;;  %s232_s3 = sshll.u32 %s198_s21, 4  ;;  %v204_v4 = vld [vmem:[#allocation5 + $0x8] sm:$0xff]  ;;  %v201_v5 = vld [vmem:[%s174_s8 + $0x10] sm:$0xff]  ;;  %s753_s12 = scalar_lea.hbm %s802_s2, %s346_s4  ;;  %s748_s3 = int_to_ptr.vmem [resolvable:$true] %s232_s3 }
  0x5a   : > { %v207_v3 = vadd.f32 %v203_v1, %v199_v0  ;;  %v205_v6 = vld [vmem:[#allocation5 + $0x10] sm:$0xff]  ;;  %v208_v7 = vadd.f32 %v204_v4, %v200_v2  ;;  %v202_v9 = vld [vmem:[%s174_s8 + $0x18] sm:$0xff]  ;;  %s216_s5 = scalar_lea.sflag [#allocation4], %s735_s18  ;;  %s478_s26 = scalar_lea.vmem %s748_s3, 512 }
  0x5b   : > { %v209_v8 = vadd.f32 %v205_v6, %v201_v5  ;;  %v206_v10 = vld [vmem:[#allocation5 + $0x18] sm:$0xff]  ;;  %p479_p11 = scmp.ne.s32.totalorder %s748_s3, %s478_s26  ;;  %s568_s15 = smov [#allocation7]  }
  0x5c   : > { %211 = vst [vmem:[%s198_s21] sm:$0xff] %v207_v3  ;;  %v210_v11 = vadd.f32 %v206_v10, %v202_v9  ;;  %212 = vst [vmem:[%s198_s21 + $0x8] sm:$0xff] %v208_v7  ;;  %s482_s16 = sshll.u32 %s568_s15, 4  ;;  %s483_s16 = int_to_ptr.vmem [resolvable:$false] %s482_s16 }
  0x5d   : > { %213 = vst [vmem:[%s198_s21 + $0x10] sm:$0xff] %v209_v8  ;;  %p480_p6 = pnand %p479_p11, %p685_p13  ;;  %s484_s23 = scalar_lea.vmem %s483_s16, 1024 }
  0x5e   : > { %214 = vst [vmem:[%s198_s21 + $0x18] sm:$0xff] %v210_v11  ;;  %p485_p9 = scmp.lt.s32.totalorder %s748_s3, %s483_s16  ;;  %p486_p12 = scmp.lt.s32.totalorder %s484_s23, %s478_s26 }
  0x5f   : > { %p481_p8 = pneg %p480_p6 }
  0x60   : > { %p487_p0 = por %p486_p12, %p485_p9 }
  0x62   : > { %p488_p5 = pnand %p487_p0, %p481_p8 }
  0x64   : > { %491 = shalt.err (!%p488_p5)
}
  0x65   : > { %s492_s24 = scalar_lea.hbm %s753_s12, 512  ;;  %s496_s30 = scalar_lea.hbm %s802_s2, 1024 }
  0x66   : > { %p493_p10 = scmp.ne.s32.totalorder %s753_s12, %s492_s24  ;;  %p497_p7 = scmp.lt.u32.totalorder %s753_s12, %s802_s2 }
  0x67   : > { %p498_p3 = scmp.lt.u32.totalorder %s496_s30, %s492_s24  ;;  %p500_p11 = scmp.lt.u32.totalorder %s492_s24, %s753_s12 }
  0x68   : > { %p494_p4 = pnand %p493_p10, %p685_p13 }
  0x69   : > { %p499_p2 = por %p498_p3, %p497_p7 }
  0x6a   : > { %p495_p1 = pneg %p494_p4 }
  0x6b   : > { %p501_p6 = por %p500_p11, %p499_p2 }
  0x6d   : > { %p502_p8 = pnand %p501_p6, %p495_p1 }
  0x6f   : > { %505 = shalt.err (!%p502_p8)
}
  0x70   : > { %353 = dma.vmem_to_hbm [thread:$0]  (%p685_p13), %s748_s3, 512, %s753_s12, %s216_s5  }
  0x71 PF: > { %s244_s7 = sand.u32 1, %s544_s9   ;;  %p821_p9 = scmp.ne.s32.totalorder %s810_s20, 0 }
  0x72   : > { %p822_p12 = scmp.ge.s32.totalorder %s564_s14, 2  ;;  %s245_s8 = scalar_lea.sflag [#allocation4], %s244_s7 }
  0x74   : > { %p364_p0 = pnand %p822_p12, %p821_p9 }
  0x76   : > { %539 = dma.done.wait (!%p364_p0), %s245_s8, 512  }
  0x77   : > { %541 = vsyncadd (!%p364_p0), %s245_s8, 4294966784  ;;  %s19_s14 = sadd.s32 1, %s564_s14   ;;  %s823_s9 = smov %s548_s10 }
  0x78   : > { %p16_p5 = scmp.ge.s32.totalorder %s19_s14, 4   ;;  %s824_s10 = smov %s552_s11 }
  0x79   : > { %s825_s11 = smov %s693_s28  ;;  %s826_s12 = smov %s560_s13 }
  0x7a   : > { %s827_s13 = smov %s829_s25  ;;  %18 = sbr.rel (!%p16_p5) target bundleno = 7 (0x7), region = 78 }
  0x81   :  { %250 = vsyncpa [#allocation3], 1 }
  0x82   :  { %252 = vsyncpa [#allocation3 + $0x1], 1 }
  0x83   :  { %253 = vsyncpa [#allocation6], 1 }
  0x84   :  { %254 = vsyncpa [#allocation4], 1 }
  0x85   :  { %256 = vsyncpa [#allocation4 + $0x1], 1 }

</bundles_post_ra>
